<compile_context>
chip_gen: v5e
topology: v5e:2x2
jax: 0.10.0
libtpu: 0.0.40
codegen_flags: <defaults>
</compile_context>

<pallas_src>
import functools

import jax
import jax.numpy as jnp
from jax import lax
from jax.experimental import pallas as pl
from jax.experimental.pallas import tpu as pltpu


_LN_EPS = 1e-5


def _patch_embed_kernel(x_ref, w_ref, posb_ref, gamma_ref, beta_ref,
                        o_ref, acc_ref):
    # Grid = (N, S_tiles, C); C is the reduction ("arbitrary", last) axis.
    #   x_ref:     (TM, P)   bf-castable token slab for (batch n, channel c, s-tile)
    #   w_ref:     (P, D)    bf16 weight slab for channel c
    #   posb_ref:  (TM, D)   positional-embedding rows with linear bias folded in
    #   gamma_ref: (1, D)    LayerNorm scale
    #   beta_ref:  (1, D)    LayerNorm shift
    #   o_ref:     (TM, D)   output block (written once, at the last channel)
    #   acc_ref:   (TM, D)   f32 VMEM accumulator, resident across the C axis
    c = pl.program_id(2)

    @pl.when(c == 0)
    def _():
        acc_ref[...] = posb_ref[...]          # init with pos + bias (f32)

    x = x_ref[...].astype(jnp.bfloat16)       # cast in VMEM; MXU runs bf16 x bf16
    acc_ref[...] += jnp.dot(x, w_ref[...], preferred_element_type=jnp.float32)

    @pl.when(c == pl.num_programs(2) - 1)
    def _():
        summed = acc_ref[...]
        mean = jnp.mean(summed, axis=-1, keepdims=True)
        centered = summed - mean
        var = jnp.mean(centered * centered, axis=-1, keepdims=True)
        normed = centered * lax.rsqrt(var + _LN_EPS)
        o_ref[...] = (normed * gamma_ref[...] + beta_ref[...]).astype(o_ref.dtype)


def _round_up(x, m):
    return (x + m - 1) // m * m


def patch_embedding_forward(img, params, *, patch):
    """img: (N, C, H, W) float32. Returns (N, S+1, d_model) float32."""
    N, C, H, W = img.shape
    P = patch * patch
    S = (H * W) // P

    w = params["w"]            # (C*P, d_model)  (c-major, matching the torch view)
    b = params["b"]            # (d_model,)
    cls_tok = params["cls"]    # (1, d_model)
    pos = params["pos"]        # (S+1, d_model)
    gamma = params["gamma"]    # (d_model,)
    beta = params["beta"]      # (d_model,)
    D = w.shape[1]

    # Free view of the NCHW image: (N, C, S, P). No transpose/concat copies.
    tokens = img.reshape(N, C, S, P)

    # Sublane-aligned sequence tile (<=128 rows). Pad S only if needed.
    TM = min(128, _round_up(S, 8))
    S_pad = _round_up(S, TM)
    if S_pad != S:
        tokens = jnp.pad(tokens, ((0, 0), (0, 0), (0, S_pad - S), (0, 0)))

    # Per-channel weight slabs (bf16 for MXU rate); bias folded into pos rows.
    w_c = w.reshape(C, P, D).astype(jnp.bfloat16)      # (C, P, D)
    pos_b = pos[1:] + b[None, :]                       # (S, D) f32
    if S_pad != S:
        pos_b = jnp.pad(pos_b, ((0, S_pad - S), (0, 0)))
    gamma2 = gamma.reshape(1, D)
    beta2 = beta.reshape(1, D)

    # Per-block VMEM footprint is tiny at these sizes; defaults are plenty
    # (revisit vmem_limit_bytes only when scaling tiles toward v7x's 64 MiB).
    out = pl.pallas_call(
        _patch_embed_kernel,
        out_shape=jax.ShapeDtypeStruct((N, S_pad, D), jnp.float32),
        grid_spec=pltpu.PrefetchScalarGridSpec(
            num_scalar_prefetch=0,
            grid=(N, S_pad // TM, C),
            in_specs=[
                pl.BlockSpec((None, None, TM, P), lambda n, s, c: (n, c, s, 0)),
                pl.BlockSpec((None, P, D), lambda n, s, c: (c, 0, 0)),
                pl.BlockSpec((TM, D), lambda n, s, c: (s, 0)),
                pl.BlockSpec((1, D), lambda n, s, c: (0, 0)),
                pl.BlockSpec((1, D), lambda n, s, c: (0, 0)),
            ],
            out_specs=pl.BlockSpec((None, TM, D), lambda n, s, c: (n, s, 0)),
            scratch_shapes=[pltpu.VMEM((TM, D), jnp.float32)],
        ),
        compiler_params=pltpu.CompilerParams(
            dimension_semantics=("parallel", "parallel", "arbitrary")),
    )(tokens, w_c, pos_b, gamma2, beta2)

    if S_pad != S:
        out = out[:, :S]

    # cls row is a per-model constant: LN(cls_tok + pos[0]) (affine applied).
    cls_sum = cls_tok[0] + pos[0]                      # (D,)
    cls_mean = jnp.mean(cls_sum)
    cls_c = cls_sum - cls_mean
    cls_var = jnp.mean(cls_c * cls_c)
    cls_row = cls_c * lax.rsqrt(cls_var + _LN_EPS) * gamma + beta
    cls_rows = jnp.broadcast_to(cls_row[None, None, :], (N, 1, D))
    return jnp.concatenate([cls_rows, out], axis=1)


def _reference_forward(img, params, *, patch, matmul_dtype=jnp.float32):
    """Pure-JAX reference mirroring the PyTorch module (optionally bf16 matmul)."""
    N, C, H, W = img.shape
    P = patch * patch
    S = (H * W) // P
    D = params["w"].shape[1]
    tokens = img.reshape(N, C, S, P).transpose(0, 2, 1, 3).reshape(N, S, C * P)
    proj = jnp.dot(tokens.astype(matmul_dtype),
                   params["w"].astype(matmul_dtype),
                   preferred_element_type=jnp.float32) + params["b"]
    cls = jnp.broadcast_to(params["cls"][None], (N, 1, D))
    cated = jnp.concatenate([cls, proj], axis=1)
    summed = cated + params["pos"][None]
    mean = jnp.mean(summed, axis=-1, keepdims=True)
    var = jnp.mean((summed - mean) ** 2, axis=-1, keepdims=True)
    normed = (summed - mean) / jnp.sqrt(var + _LN_EPS)
    return normed * params["gamma"] + params["beta"]


if __name__ == "__main__":
    # Small, module-consistent shapes.
    N, C, H, W = 2, 4, 16, 16
    patch = 4
    d_model = 32
    P = patch * patch
    S = (H * W) // P
    input_dim = P * C

    key = jax.random.PRNGKey(0)
    k_img, k_cls, k_w, k_b, k_pos = jax.random.split(key, 5)

    img = jax.random.normal(k_img, (N, C, H, W), jnp.float32)

    bound = 1.0 / jnp.sqrt(input_dim)
    params = {
        "cls": jax.random.normal(k_cls, (1, d_model), jnp.float32),
        "w": jax.random.uniform(k_w, (input_dim, d_model), jnp.float32,
                                -bound, bound),
        "b": jax.random.uniform(k_b, (d_model,), jnp.float32, -bound, bound),
        "pos": jax.random.normal(k_pos, (S + 1, d_model), jnp.float32),
        "gamma": jnp.ones((d_model,), jnp.float32),
        "beta": jnp.zeros((d_model,), jnp.float32),
    }

    fwd = jax.jit(functools.partial(patch_embedding_forward, patch=patch))
    out = fwd(img, params)
    jax.block_until_ready(out)

    assert out.shape == (N, S + 1, d_model)

    # Tight check against a reference that uses the same bf16-in / f32-acc matmul.
    ref_bf16 = _reference_forward(img, params, patch=patch,
                                  matmul_dtype=jnp.bfloat16)
    assert jnp.allclose(out, ref_bf16, atol=1e-3, rtol=1e-3), \
        float(jnp.max(jnp.abs(out - ref_bf16)))

    # Looser semantic check against the full-f32 reference (bf16 matmul inputs
    # intentionally trade a little precision for throughput).
    ref_f32 = _reference_forward(img, params, patch=patch,
                                 matmul_dtype=jnp.float32)
    assert jnp.allclose(out, ref_f32, atol=2e-2, rtol=2e-2), \
        float(jnp.max(jnp.abs(out - ref_f32)))

    print("KERNEL_OK")
</pallas_src>

<mosaic_0001>
module attributes {stable_mosaic.version = 11 : i64} {
  func.func @_patch_embed_kernel(%arg0: i32, %arg1: i32, %arg2: i32, %arg3: memref<1x1x16x16xf32, #tpu.memory_space<vmem>>, %arg4: memref<1x16x32xbf16, #tpu.memory_space<vmem>>, %arg5: memref<16x32xf32, #tpu.memory_space<vmem>>, %arg6: memref<1x32xf32, #tpu.memory_space<vmem>>, %arg7: memref<1x32xf32, #tpu.memory_space<vmem>>, %arg8: memref<1x16x32xf32, #tpu.memory_space<vmem>>, %arg9: memref<16x32xf32, #tpu.memory_space<vmem>>) attributes {dimension_semantics = [#tpu.dimension_semantics<parallel>, #tpu.dimension_semantics<parallel>, #tpu.dimension_semantics<arbitrary>], iteration_bounds = array<i64: 2, 1, 4>, scalar_prefetch = 0 : i64, scratch_operands = 1 : i64, tpu.core_type = #tpu.core_type<tc>, window_params = [{transform_indices = @transform_0, window_bounds = array<i64: 1, 1, 16, 16>}, {transform_indices = @transform_1, window_bounds = array<i64: 1, 16, 32>}, {transform_indices = @transform_2, window_bounds = array<i64: 16, 32>}, {pipeline_mode = #tpu.pipeline_mode<synchronous>, transform_indices = @transform_3, window_bounds = array<i64: 1, 32>}, {pipeline_mode = #tpu.pipeline_mode<synchronous>, transform_indices = @transform_4, window_bounds = array<i64: 1, 32>}, {transform_indices = @transform_5, window_bounds = array<i64: 1, 16, 32>}]} {
    %c0_i32 = arith.constant 0 : i32
    %0 = arith.cmpi eq, %arg2, %c0_i32 : i32
    %1 = arith.extui %0 : i1 to i32
    %c0_i32_0 = arith.constant 0 : i32
    %2 = arith.cmpi ne, %1, %c0_i32_0 : i32
    scf.if %2 {
      %c0_12 = arith.constant 0 : index
      %c0_13 = arith.constant 0 : index
      %15 = vector.load %arg5[%c0_12, %c0_13] : memref<16x32xf32, #tpu.memory_space<vmem>>, vector<16x32xf32>
      %c0_14 = arith.constant 0 : index
      %c0_15 = arith.constant 0 : index
      %16 = vector.load %arg9[%c0_14, %c0_15] : memref<16x32xf32, #tpu.memory_space<vmem>>, vector<16x32xf32>
      tpu.vector_store %arg9[%c0_14, %c0_15], %15 {strides = array<i32>} : memref<16x32xf32, #tpu.memory_space<vmem>>, vector<16x32xf32>,
    } else {
    }
    %c0 = arith.constant 0 : index
    %c0_1 = arith.constant 0 : index
    %c0_2 = arith.constant 0 : index
    %c0_3 = arith.constant 0 : index
    %3 = vector.load %arg3[%c0, %c0_1, %c0_2, %c0_3] : memref<1x1x16x16xf32, #tpu.memory_space<vmem>>, vector<1x1x16x16xf32>
    %4 = vector.shape_cast %3 : vector<1x1x16x16xf32> to vector<16x16xf32>
    %5 = arith.truncf %4 : vector<16x16xf32> to vector<16x16xbf16>
    %c0_4 = arith.constant 0 : index
    %c0_5 = arith.constant 0 : index
    %6 = vector.load %arg9[%c0_4, %c0_5] : memref<16x32xf32, #tpu.memory_space<vmem>>, vector<16x32xf32>
    %c0_6 = arith.constant 0 : index
    %c0_7 = arith.constant 0 : index
    %c0_8 = arith.constant 0 : index
    %7 = vector.load %arg4[%c0_6, %c0_7, %c0_8] : memref<1x16x32xbf16, #tpu.memory_space<vmem>>, vector<1x16x32xbf16>
    %8 = vector.shape_cast %7 : vector<1x16x32xbf16> to vector<16x32xbf16>
    %cst = arith.constant dense<0.000000e+00> : vector<16x32xf32>
    %9 = tpu.matmul %5, %8, %cst {dimension_numbers = #tpu.dot_dimension_numbers<[1], [0], [0], [1], [0, 0, 1, 1], [], []>} : vector<16x16xbf16>, vector<16x32xbf16>, vector<16x32xf32> -> vector<16x32xf32>
    %10 = arith.addf %6, %9 : vector<16x32xf32>
    %c0_9 = arith.constant 0 : index
    %c0_10 = arith.constant 0 : index
    %11 = vector.load %arg9[%c0_9, %c0_10] : memref<16x32xf32, #tpu.memory_space<vmem>>, vector<16x32xf32>
    tpu.vector_store %arg9[%c0_9, %c0_10], %10 {strides = array<i32>} : memref<16x32xf32, #tpu.memory_space<vmem>>, vector<16x32xf32>,
    %c3_i32 = arith.constant 3 : i32
    %12 = arith.cmpi eq, %arg2, %c3_i32 : i32
    %13 = arith.extui %12 : i1 to i32
    %c0_i32_11 = arith.constant 0 : i32
    %14 = arith.cmpi ne, %13, %c0_i32_11 : i32
    scf.if %14 {
      %c0_12 = arith.constant 0 : index
      %c0_13 = arith.constant 0 : index
      %15 = vector.load %arg9[%c0_12, %c0_13] : memref<16x32xf32, #tpu.memory_space<vmem>>, vector<16x32xf32>
      %cst_14 = arith.constant dense<0.000000e+00> : vector<16xf32>
      %16 = vector.multi_reduction <add>, %15, %cst_14 [1] : vector<16x32xf32> to vector<16xf32>
      %17 = vector.shape_cast %16 : vector<16xf32> to vector<16x1xf32>
      %cst_15 = arith.constant 3.200000e+01 : f32
      %18 = vector.broadcast %cst_15 : f32 to vector<16x1xf32>
      %19 = arith.divf %17, %18 : vector<16x1xf32>
      %20 = vector.broadcast %19 : vector<16x1xf32> to vector<16x32xf32>
      %21 = arith.subf %15, %20 : vector<16x32xf32>
      %22 = arith.mulf %21, %21 : vector<16x32xf32>
      %cst_16 = arith.constant dense<0.000000e+00> : vector<16xf32>
      %23 = vector.multi_reduction <add>, %22, %cst_16 [1] : vector<16x32xf32> to vector<16xf32>
      %24 = vector.shape_cast %23 : vector<16xf32> to vector<16x1xf32>
      %cst_17 = arith.constant 3.200000e+01 : f32
      %25 = vector.broadcast %cst_17 : f32 to vector<16x1xf32>
      %26 = arith.divf %24, %25 : vector<16x1xf32>
      %cst_18 = arith.constant 9.99999974E-6 : f32
      %27 = vector.broadcast %cst_18 : f32 to vector<16x1xf32>
      %28 = arith.addf %26, %27 : vector<16x1xf32>
      %29 = math.rsqrt %28 : vector<16x1xf32>
      %30 = vector.broadcast %29 : vector<16x1xf32> to vector<16x32xf32>
      %31 = arith.mulf %21, %30 : vector<16x32xf32>
      %c0_19 = arith.constant 0 : index
      %c0_20 = arith.constant 0 : index
      %32 = vector.load %arg6[%c0_19, %c0_20] : memref<1x32xf32, #tpu.memory_space<vmem>>, vector<1x32xf32>
      %33 = vector.broadcast %32 : vector<1x32xf32> to vector<16x32xf32>
      %34 = arith.mulf %31, %33 : vector<16x32xf32>
      %c0_21 = arith.constant 0 : index
      %c0_22 = arith.constant 0 : index
      %35 = vector.load %arg7[%c0_21, %c0_22] : memref<1x32xf32, #tpu.memory_space<vmem>>, vector<1x32xf32>
      %36 = vector.broadcast %35 : vector<1x32xf32> to vector<16x32xf32>
      %37 = arith.addf %34, %36 : vector<16x32xf32>
      %c0_23 = arith.constant 0 : index
      %c0_24 = arith.constant 0 : index
      %c0_25 = arith.constant 0 : index
      %38 = vector.load %arg8[%c0_23, %c0_24, %c0_25] : memref<1x16x32xf32, #tpu.memory_space<vmem>>, vector<1x16x32xf32>
      %39 = vector.shape_cast %38 : vector<1x16x32xf32> to vector<16x32xf32>
      %40 = vector.shape_cast %37 : vector<16x32xf32> to vector<1x16x32xf32>
      tpu.vector_store %arg8[%c0_23, %c0_24, %c0_25], %40 {strides = array<i32>} : memref<1x16x32xf32, #tpu.memory_space<vmem>>, vector<1x16x32xf32>,
    } else {
    }
    return
  }
  func.func @transform_0(%arg0: i32, %arg1: i32, %arg2: i32) -> (i32, i32, i32, i32) {
    %c0_i32 = arith.constant 0 : i32
    %c0_i32_0 = arith.constant 0 : i32
    return %arg0, %arg2, %arg1, %c0_i32 : i32, i32, i32, i32
  }
  func.func @transform_1(%arg0: i32, %arg1: i32, %arg2: i32) -> (i32, i32, i32) {
    %c0_i32 = arith.constant 0 : i32
    %c0_i32_0 = arith.constant 0 : i32
    %c0_i32_1 = arith.constant 0 : i32
    return %arg2, %c0_i32, %c0_i32_0 : i32, i32, i32
  }
  func.func @transform_2(%arg0: i32, %arg1: i32, %arg2: i32) -> (i32, i32) {
    %c0_i32 = arith.constant 0 : i32
    %c0_i32_0 = arith.constant 0 : i32
    return %arg1, %c0_i32 : i32, i32
  }
  func.func @transform_3(%arg0: i32, %arg1: i32, %arg2: i32) -> (i32, i32) {
    %c0_i32 = arith.constant 0 : i32
    %c0_i32_0 = arith.constant 0 : i32
    %c0_i32_1 = arith.constant 0 : i32
    return %c0_i32, %c0_i32_0 : i32, i32
  }
  func.func @transform_4(%arg0: i32, %arg1: i32, %arg2: i32) -> (i32, i32) {
    %c0_i32 = arith.constant 0 : i32
    %c0_i32_0 = arith.constant 0 : i32
    %c0_i32_1 = arith.constant 0 : i32
    return %c0_i32, %c0_i32_0 : i32, i32
  }
  func.func @transform_5(%arg0: i32, %arg1: i32, %arg2: i32) -> (i32, i32, i32) {
    %c0_i32 = arith.constant 0 : i32
    %c0_i32_0 = arith.constant 0 : i32
    return %arg0, %arg1, %c0_i32 : i32, i32, i32
  }
}

</mosaic_0001>

<bundles_post_ra>
// kernel: patch_embedding_forward.1
= control target key start
LH: loop header
LB: loop body
LE: loop exit
PB: predicated region body
PF: predicated region fallthrough
CT: control target
= control target key end

     0   :  { %10 = vsyncpa [#allocation4], 0  ;;  %s959_s0 = inlined_call_operand.hbm [shape: f32[2,4,16,16], index: 0, kind: input, shape index: {}]   ;;  %s960_s1 = inlined_call_operand.vmem [shape: bf16[4,16,32], index: 1, kind: input, shape index: {}]   ;;  %s961_s2 = inlined_call_operand.vmem [shape: f32[16,32], index: 2, kind: input, shape index: {}]   ;;  %s962_s3 = inlined_call_operand.vmem [shape: f32[1,32], index: 3, kind: input, shape index: {}]   ;;  %s963_s4 = inlined_call_operand.vmem [shape: f32[1,32], index: 4, kind: input, shape index: {}]   ;;  %s964_s5 = inlined_call_operand.vmem [shape: f32[2,16,32], index: 5, kind: output, shape index: {}]  }
   0x1   :  { %12 = vsyncpa [#allocation4 + $0x1], 0  ;;  %s815_s18 = smov 0   ;;  %s817_s19 = smov 0  }
   0x2   :  { %s819_s20 = smov 0   ;;  %s821_s21 = smov 0  }
   0x3   :  { %s823_s22 = smov 0   ;;  %s825_s23 = smov 0  }
   0x4   :  { %s827_s24 = smov 0   ;;  %s829_s25 = smov 0  }
   0x5 LB: > { %s575_s26 = sadd.s32 4294967295, %s780_s25   ;;  %s30_s27 = sadd.s32 1, %s772_s23  ;;  %s780_s25 = sphi %s829_s25, %s18_s25   ;;  %s776_s24 = sphi %s827_s24, %s979_s24   ;;  %s772_s23 = sphi %s825_s23, %s978_s23   ;;  %s768_s22 = sphi %s823_s22, %s977_s22   ;;  %s764_s21 = sphi %s821_s21, %s976_s21   ;;  %s760_s20 = sphi %s819_s20, %s975_s20   ;;  %s756_s19 = sphi %s817_s19, %s974_s19   ;;  %s752_s18 = sphi %s815_s18, %s973_s18  }
   0x6   : > { %p31_p0 = scmp.ge.s32.totalorder %s30_s27, 4  ;;  %s37_s28 = sadd.s32 1, %s776_s24 }
   0x7   : > { %s48_s29 = sadd.s32 1, %s760_s20  ;;  %p55_p1 = scmp.ne.s32.totalorder %s760_s20, %s756_s19 }
   0x8   : > { %s981_s27 = smov (%p31_p0, %s30_s27), 0  ;;  %s983_s28 = smov (!%p31_p0, %s37_s28), %s776_s24 }
   0x9   : > { %967 = sst [smem:[#allocation6_spill]] %s981_s27  ;;  %s42_s30 = ssub.s32 %s772_s23, %s981_s27 }
   0xa   : > { %p56_p2 = scmp.eq.s32.totalorder %s780_s25, 0  ;;  %p39_p3 = scmp.ge.s32.totalorder %s983_s28, 2 }
   0xb   : > { %p61_p4 = scmp.ne.s32.totalorder %s756_s19, %s752_s18  ;;  %p62_p6 = scmp.eq.s32.totalorder %s575_s26, 0 }
   0xc   : > { %p866_p5 = por %p56_p2, %p55_p1  ;;  %s985_s28 = smov (%p39_p3, %s983_s28), 0 }
   0xd   : > { %969 = sst [smem:[#allocation7_spill]] %s985_s28  ;;  %p872_p7 = por %p62_p6, %p61_p4 }
   0xe   : > { %s41_s8 = ssub.s32 %s776_s24, %s985_s28  ;;  %p608_p8 = scmp.lt.s32.totalorder %s780_s25, 8 }
   0xf   : > { %s43_s9 = sor.u32 %s42_s30, %s41_s8  ;;  %s222_s10 = sand.u32 1, %s760_s20  }
  0x10   : > { %p46_p9 = scmp.eq.s32.totalorder %s43_s9, 0  ;;  %s580_s11 = sshll.u32 %s222_s10, 4 }
  0x11   : > { %s581_s12 = sshll.u32 %s772_s23, 1  ;;  %s582_s14 = sshll.u32 %s776_s24, 3 }
  0x12   : > { %s882_s13 = scalar_select %p46_p9, %s760_s20, %s48_s29  }
  0x13   : > { %s233_s15 = sadd.s32 %s582_s14, %s581_s12  ;;  %s226_s16 = scalar_lea.vmem [#allocation3], %s580_s11 }
  0x14   : > { %s238_s17 = sshll.u32 %s226_s16, 4  ;;  %s583_s18 = sshll.u32 %s233_s15, 3  ;;  %s239_s17 = int_to_ptr.vmem [resolvable:$true] %s238_s17 }
  0x15   : > { %s235_s28 = scalar_lea.hbm %s959_s0, %s583_s18  ;;  %p605_p10 = pnand %p608_p8, %p866_p5 }
  0x16   : > { %s236_s30 = sshll.u32 %s235_s28, 4  ;;  %p584_p11 = scmp.ge.s32.totalorder %s780_s25, 1  ;;  %s237_s30 = int_to_ptr.hbm [resolvable:$true] %s236_s30 }
  0x17   : > { %s223_s8 = scalar_lea.sflag [#allocation4], %s222_s10  ;;  %s782_s29 = smov 128  }
  0x18   : > { %s783_s9 = smov 8   ;;  %p254_p12 = scmp.lt.s32.totalorder %s780_s25, 9 }
  0x19   : > { %607 = dma.hbm_to_vmem [thread:$0]  (!%p605_p10), %s237_s30, 256, %s239_s17, %s223_s8, %s782_s29, %s782_s29, %s783_s9  }
  0x1a   : > { %p255_p13 = pnand %p584_p11, %p254_p12 }
  0x1b   : > { %s260_s11 = sand.u32 (!%p255_p13), 1, %s756_s19  }
  0x1c   : > { %258 = sbr.rel (%p255_p13) target bundleno = 464 (0x1d0), region = 40  ;;  %s585_s12 = sshll.u32 (!%p255_p13), %s260_s11, 4 }
  0x1d   : > { %s261_s14 = scalar_lea.sflag (!%p255_p13), [#allocation4], %s260_s11  ;;  %s264_s27 = scalar_lea.vmem (!%p255_p13), [#allocation3], %s585_s12 }
  0x21   : > { %747 = dma.done.wait (%p872_p7), %s261_s14, 256  }
  0x22   : > { %749 = vsyncadd (%p872_p7), %s261_s14, 4294967040  ;;  %p307_p0 = scmp.lt.s32.totalorder %s764_s21, 3  ;;  %p319_p1 = scmp.lt.s32.totalorder %s768_s22, 1 }
  0x23   : > { %p590_p2 = scmp.ne.s32.totalorder %s764_s21, 0 }
  0x24   : > { %s308_s28 = scalar_select %p307_p0, %s764_s21, 3 }
  0x25   : > { %s987_s22 = smov (!%p319_p1, %s768_s22), 1  ;;  %332 = sbr.rel (%p590_p2) target bundleno = 45 (0x2d), region = 48 }
  0x26   : > { %s599_s6 = sshll.u32 %s308_s28, 3  ;;  %s600_s17 = sshll.u32 %s987_s22, 4 }
  0x27   : > { %s311_s16 = scalar_lea.vmem %s960_s1, %s599_s6  ;;  %s909_s30 = scalar_lea.vmem %s964_s5, %s600_s17 }
  0x2a   : > { %v333_v0 = vld [vmem:[%s961_s2] sm:$0xff]  ;;  %vm335_vm0 = vcmask 261120   ;;  %v334_v1 = vld [vmem:[%s961_s2 + $0x8] sm:$0xff] }
  0x2b   : > { %336 = vst.msk [vmem:[#allocation2] sm:$0xff] %vm335_vm0, %v333_v0 }
  0x2c   : > { %337 = vst.msk [vmem:[#allocation2 + $0x8] sm:$0xff] %vm335_vm0, %v334_v1 }
  0x2d PF: > { %v601_v2 = vld [vmem:[%s311_s16] sm:$0xff]  ;;  %v339_v4 = vld [vmem:[%s264_s27 + $0x8] sm:$0xff]  ;;  %vm351_vm1 = vcmask 130048   ;;  %vm371_vm2 = vcmask 261120   ;;  %p596_p3 = scmp.ne.s32.totalorder %s764_s21, 3 }
  0x2e   : > { %v338_v3 = vld [vmem:[%s264_s27] sm:$0xff]  ;;  %362 = vmatpush.bf16.msra.mxu0 %v601_v2 }
  0x2f   : > { %v340_v5 = vpack.c.bf16 %v339_v4, %v338_v3 }
  0x31   : > { %595 = vmatmul.msk.bf16.vlgmr.msra.gmra.mxu0 %vm351_vm1, %v340_v5 }
  0x32   : > { %v341_v6 = vld [vmem:[#allocation2] sm:$0xff] }
  0x33   : > { %v342_v9 = vld [vmem:[#allocation2 + $0x8] sm:$0xff] }
  0xae   : > { %v364_v7 = vpop.f32.mrf.mxu0 }
  0xaf   : > { %v369_v8 = vadd.f32 %v364_v7, %v341_v6 }
  0xb1   : > { %372 = vst.msk [vmem:[#allocation2] sm:$0xff] %vm371_vm2, %v369_v8 }
  0xb5   : > { %377 = sbr.rel (%p596_p3) target bundleno = 464 (0x1d0), region = 52 }
  0xb6   : > { %v366_v10 = vpop.f32.mrf.mxu0 }
  0xb7   : > { %v370_v11 = vadd.f32 %v366_v10, %v342_v9 }
  0xb9   : > { %373 = vst.msk [vmem:[#allocation2 + $0x8] sm:$0xff] %vm371_vm2, %v370_v11 }
  0xba   : > { %v378_v12 = vld [vmem:[#allocation2] sm:$0xff]  ;;  %v784_v16 = vmov 32.0  }
  0xbb   : > { %v380_v13 = vsel %vm371_vm2, %v378_v12, 0.0  ;;  %678 = vrcp.f32 %v784_v16  ;;  %v676_v47 = vld [vmem:[%s962_s3] ss:$0 sm:$0xff] }
  0xbc   : > { %381 = vadd.xlane.f32.xlu0 %v380_v13  ;;  %v677_v50 = vld [vmem:[%s963_s4] ss:$0 sm:$0xff] }
  0xc0   : > { %v379_v14 = vld [vmem:[#allocation2 + $0x8] sm:$0xff] }
  0xc1   : > { %v383_v15 = vsel %vm371_vm2, %v379_v14, 0.0  ;;  %v679_v17 = vpop.eup %678 }
  0xc2   : > { %v387_v18 = vmul.f32 32.0, %v679_v17  ;;  %vm391_vm3 = vweird.f32 %v679_v17 }
  0xc4   : > { %384 = vadd.xlane.f32.xlu0 %v383_v15  ;;  %v388_v19 = vsub.f32 1.0, %v387_v18 }
  0xc6   : > { %v389_v20 = vmul.f32 %v679_v17, %v388_v19 }
  0xc8   : > { %v390_v21 = vadd.f32 %v679_v17, %v389_v20 }
  0xca   : > { %v392_v22 = vsel %vm391_vm3, %v679_v17, %v390_v21 }
 0x12f   : > { %v382_v23 = vpop.xlane.xlu0 %381 }
 0x130   : > { %v393_v24 = vmul.f32 %v392_v22, %v382_v23 }
 0x132   : > { %v395_v25 = vsub.f32 %v378_v12, %v393_v24 }
 0x134   : > { %v397_v26 = vmul.f32 %v395_v25, %v395_v25 }
 0x136   : > { %v399_v27 = vsel %vm371_vm2, %v397_v26, 0.0 }
 0x137   : > { %400 = vadd.xlane.f32.xlu1 %v399_v27  ;;  %v385_v28 = vpop.xlane.xlu0 %384 }
 0x138   : > { %v394_v29 = vmul.f32 %v392_v22, %v385_v28 }
 0x13a   : > { %v396_v30 = vsub.f32 %v379_v14, %v394_v29 }
 0x13c   : > { %v398_v31 = vmul.f32 %v396_v30, %v396_v30 }
 0x13e   : > { %v402_v32 = vsel %vm371_vm2, %v398_v31, 0.0 }
 0x13f   : > { %403 = vadd.xlane.f32.xlu1 %v402_v32 }
 0x1aa   : > { %v401_v33 = vpop.xlane.xlu1 %400 }
 0x1ab   : > { %v405_v34 = vmul.f32 %v401_v33, %v392_v22 }
 0x1ad   : > { %v407_v35 = vadd.f32 1e-05, %v405_v34 }
 0x1af   : > { %680 = vrsqrt.f32 %v407_v35  ;;  %vm415_vm5 = vweird.f32 %v407_v35 }
 0x1b2   : > { %v404_v36 = vpop.xlane.xlu1 %403 }
 0x1b3   : > { %v406_v37 = vmul.f32 %v404_v36, %v392_v22 }
 0x1b5   : > { %v681_v38 = vpop.eup %680  ;;  %v408_v39 = vadd.f32 1e-05, %v406_v37 }
 0x1b6   : > { %v410_v40 = vmul.f32 %v681_v38, %v407_v35  ;;  %vm416_vm4 = vweird.f32 %v681_v38 }
 0x1b7   : > { %682 = vrsqrt.f32 %v408_v39  ;;  %vm417_vm6 = vmor %vm415_vm5, %vm416_vm4  ;;  %vm425_vm8 = vweird.f32 %v408_v39 }
 0x1b8   : > { %v411_v41 = vmul.f32 %v681_v38, %v410_v40 }
 0x1ba   : > { %v412_v42 = vmul.f32 0.5, %v411_v41 }
 0x1bc   : > { %v413_v43 = vsub.f32 1.5, %v412_v42 }
 0x1bd   : > { %v683_v44 = vpop.eup %682 }
 0x1be   : > { %v414_v45 = vmul.f32 %v681_v38, %v413_v43  ;;  %v420_v46 = vmul.f32 %v683_v44, %v408_v39  ;;  %vm426_vm7 = vweird.f32 %v683_v44 }
 0x1bf   : > { %vm427_vm9 = vmor %vm425_vm8, %vm426_vm7 }
 0x1c0   : > { %v418_v48 = vsel %vm417_vm6, %v681_v38, %v414_v45  ;;  %v421_v49 = vmul.f32 %v683_v44, %v420_v46 }
 0x1c1   : > { %v429_v51 = vmul.f32 %v418_v48, %v395_v25 }
 0x1c2   : > { %v422_v52 = vmul.f32 0.5, %v421_v49 }
 0x1c3   : > { %v435_v53 = vmul.f32 %v676_v47, %v429_v51 }
 0x1c4   : > { %v423_v54 = vsub.f32 1.5, %v422_v52 }
 0x1c5   : > { %v441_v55 = vadd.f32 %v677_v50, %v435_v53 }
 0x1c6   : > { %v424_v56 = vmul.f32 %v683_v44, %v423_v54 }
 0x1c7   : > { %443 = vst.msk [vmem:[%s909_s30] sm:$0xff] %vm371_vm2, %v441_v55 }
 0x1c8   : > { %v428_v57 = vsel %vm427_vm9, %v683_v44, %v424_v56 }
 0x1c9   : > { %v430_v58 = vmul.f32 %v428_v57, %v396_v30 }
 0x1cb   : > { %v436_v59 = vmul.f32 %v676_v47, %v430_v58 }
 0x1cd   : > { %v442_v60 = vadd.f32 %v677_v50, %v436_v59 }
 0x1cf   : > { %444 = vst.msk [vmem:[%s909_s30 + $0x8] sm:$0xff] %vm371_vm2, %v442_v60 }
 0x1d0 PF: > { %s18_s25 = sadd.s32 1, %s780_s25   ;;  %s971_s14 = sld [smem:[#allocation6_spill]] }
 0x1d1   : > { %p15_p4 = scmp.ge.s32.totalorder %s18_s25, 10   ;;  %s972_s27 = sld [smem:[#allocation7_spill]] }
 0x1d2   : > { %s973_s18 = smov %s756_s19  ;;  %s974_s19 = smov %s760_s20 }
 0x1d3   : > { %s975_s20 = smov %s882_s13  ;;  %s976_s21 = smov %s772_s23 }
 0x1d4   : > { %s977_s22 = smov %s776_s24  ;;  %17 = sbr.rel (!%p15_p4) target bundleno = 5 (0x5), region = 94 }
 0x1d6   : > { %s978_s23 = smov %s971_s14 }
 0x1d7   : > { %s979_s24 = smov %s972_s27 }
 0x1d9   :  { %475 = vsyncpa [#allocation4], 1 }
 0x1da   :  { %477 = vsyncpa [#allocation4 + $0x1], 1 }

</bundles_post_ra>
